<compile_context>
chip_gen: v7x
topology: tpu7x:2x2x1
jax: 0.10.0
libtpu: 0.0.40
codegen_flags: <defaults>
</compile_context>

<pallas_src>
import functools

import jax
import jax.numpy as jnp
from jax.experimental import pallas as pl
from jax.experimental.pallas import tpu as pltpu

EPS = 1e-5


def _pick_spatial_tile(l, cap=512):
    """Largest multiple of 128 that divides l (<= cap); fall back to full l."""
    best = None
    t = 128
    while t <= min(l, cap):
        if l % t == 0:
            best = t
        t += 128
    return best if best is not None else l


def stats_kernel(gb_ref, x_ref, ss_ref, acc_s, acc_q, *, inv_m):
    # gb_ref:  (Cin, 2)   packed [gamma | beta]
    # x_ref:   (Cin, tl)  one spatial tile of one batch element (f32)
    # ss_ref:  (Cin, 2)   output: packed [scale | shift]
    # acc_s/acc_q: (Cin, tl) VMEM accumulators (elementwise; deferred reduce)
    first = (pl.program_id(0) == 0) & (pl.program_id(1) == 0)
    last = (pl.program_id(0) == pl.num_programs(0) - 1) & (
        pl.program_id(1) == pl.num_programs(1) - 1
    )

    @pl.when(first)
    def _():
        acc_s[...] = jnp.zeros_like(acc_s)
        acc_q[...] = jnp.zeros_like(acc_q)

    x = x_ref[...].astype(jnp.float32)
    acc_s[...] += x
    acc_q[...] += x * x

    @pl.when(last)
    def _():
        # Single cross-lane (XLU) reduction for the whole streaming pass.
        s = jnp.sum(acc_s[...], axis=1, keepdims=True)   # (Cin, 1)
        q = jnp.sum(acc_q[...], axis=1, keepdims=True)   # (Cin, 1)
        mean = s * inv_m
        # Clamp: single-pass E[x^2] - mean^2 can go slightly negative.
        var = jnp.maximum(q * inv_m - mean * mean, 0.0)
        inv_std = jax.lax.rsqrt(var + EPS)
        gb = gb_ref[...]
        gamma = gb[:, 0:1]
        beta = gb[:, 1:2]
        scale = inv_std * gamma
        shift = beta - mean * scale
        ss_ref[:, 0:1] = scale
        ss_ref[:, 1:2] = shift


def apply_kernel(ss_ref, x_ref, w_ref, o_ref):
    # ss_ref: (Cin, 2)    per-channel [scale | shift]
    # x_ref:  (Cin, tl)   input tile (f32)
    # w_ref:  (Cout, Cin) conv1x1 weight, bf16, torch OI layout (no transpose)
    # o_ref:  (Cout, tl)  output tile (NCHW-native)
    x = x_ref[...].astype(jnp.float32)
    ss = ss_ref[...]
    scale = ss[:, 0:1]
    shift = ss[:, 1:2]
    xr = jnp.maximum(x * scale + shift, 0.0)
    # bf16 MXU matmul with f32 accumulation.
    o_ref[...] = jnp.dot(
        w_ref[...], xr.astype(jnp.bfloat16), preferred_element_type=jnp.float32
    ).astype(o_ref.dtype)


def bn_relu_conv1x1(x_nchw, gamma, beta, w_torch):
    """x_nchw: (N, Cin, H, W); w_torch: (Cout, Cin, 1, 1). Returns NCHW."""
    n, cin, h, w = x_nchw.shape
    cout = w_torch.shape[0]
    l = h * w

    x3d = x_nchw.reshape(n, cin, l)                       # free reshape (NCHW-native)
    w2d = w_torch[:, :, 0, 0].astype(jnp.bfloat16)        # (Cout, Cin), OI as-is
    gb = jnp.stack([gamma, beta], axis=1).astype(jnp.float32)  # (Cin, 2)

    tl = _pick_spatial_tile(l)
    n_lt = l // tl
    inv_m = 1.0 / float(n * l)

    # ---- Phase 1: batch statistics -> per-channel scale/shift (Cin, 2).
    ss = pl.pallas_call(
        functools.partial(stats_kernel, inv_m=inv_m),
        out_shape=jax.ShapeDtypeStruct((cin, 2), jnp.float32),
        grid=(n, n_lt),
        in_specs=[
            pl.BlockSpec((cin, 2), lambda i, j: (0, 0)),
            pl.BlockSpec((None, cin, tl), lambda i, j: (i, 0, j)),
        ],
        out_specs=pl.BlockSpec((cin, 2), lambda i, j: (0, 0)),
        scratch_shapes=[
            pltpu.VMEM((cin, tl), jnp.float32),
            pltpu.VMEM((cin, tl), jnp.float32),
        ],
        compiler_params=pltpu.CompilerParams(
            dimension_semantics=("arbitrary", "arbitrary")
        ),
    )(gb, x3d)

    # ---- Phase 2: normalize + ReLU + 1x1 conv, streamed over spatial tiles.
    out3d = pl.pallas_call(
        apply_kernel,
        out_shape=jax.ShapeDtypeStruct((n, cout, l), x_nchw.dtype),
        grid=(n, n_lt),
        in_specs=[
            pl.BlockSpec((cin, 2), lambda i, j: (0, 0)),
            pl.BlockSpec((None, cin, tl), lambda i, j: (i, 0, j)),
            pl.BlockSpec((cout, cin), lambda i, j: (0, 0)),
        ],
        out_specs=pl.BlockSpec((None, cout, tl), lambda i, j: (i, 0, j)),
        compiler_params=pltpu.CompilerParams(
            dimension_semantics=("parallel", "parallel")
        ),
    )(ss, x3d, w2d)

    return out3d.reshape(n, cout, h, w)


def reference(x_nchw, gamma, beta, w_torch):
    # Pure-JAX reference with identical semantics (training-mode BN, f32).
    mean = jnp.mean(x_nchw, axis=(0, 2, 3), keepdims=True)
    var = jnp.var(x_nchw, axis=(0, 2, 3), keepdims=True)  # biased
    xn = (x_nchw - mean) * jax.lax.rsqrt(var + EPS)
    xn = xn * gamma.reshape(1, -1, 1, 1) + beta.reshape(1, -1, 1, 1)
    xr = jnp.maximum(xn, 0.0)
    return jax.lax.conv_general_dilated(
        xr, w_torch, window_strides=(1, 1), padding="VALID",
        dimension_numbers=("NCHW", "OIHW", "NCHW"),
    )


if __name__ == "__main__":
    # Small shapes consistent with the module: Cin must be 64, Cout = 256.
    # H=W=32 -> L=1024, tl=512, so both grid axes (batch, spatial tiles) are
    # exercised: grid = (2, 2).
    N, CIN, H, W, COUT = 2, 64, 32, 32, 256

    key = jax.random.PRNGKey(0)
    kx, kg, kb, kw = jax.random.split(key, 4)

    x = jax.random.normal(kx, (N, CIN, H, W), dtype=jnp.float32)
    gamma = 1.0 + 0.1 * jax.random.normal(kg, (CIN,), dtype=jnp.float32)
    beta = 0.1 * jax.random.normal(kb, (CIN,), dtype=jnp.float32)
    w = 0.1 * jax.random.normal(kw, (COUT, CIN, 1, 1), dtype=jnp.float32)

    out = jax.block_until_ready(bn_relu_conv1x1(x, gamma, beta, w))
    ref = jax.block_until_ready(reference(x, gamma, beta, w))

    assert out.shape == (N, COUT, H, W), out.shape
    max_err = float(jnp.max(jnp.abs(out - ref)))
    # Tolerance loosened vs. the pure-f32 version because the conv matmul runs
    # in bf16 on the MXU (f32 accumulation).
    assert jnp.allclose(out, ref, atol=3e-2, rtol=3e-2), max_err
    print("KERNEL_OK")
</pallas_src>

<mosaic_0001>
module attributes {stable_mosaic.version = 11 : i64} {
  func.func @stats_kernel(%arg0: i32, %arg1: i32, %arg2: memref<64x2xf32, #tpu.memory_space<vmem>>, %arg3: memref<1x64x512xf32, #tpu.memory_space<vmem>>, %arg4: memref<64x2xf32, #tpu.memory_space<vmem>>, %arg5: memref<64x512xf32, #tpu.memory_space<vmem>>, %arg6: memref<64x512xf32, #tpu.memory_space<vmem>>) attributes {dimension_semantics = [#tpu.dimension_semantics<arbitrary>, #tpu.dimension_semantics<arbitrary>], iteration_bounds = array<i64: 2, 2>, scalar_prefetch = 0 : i64, scratch_operands = 2 : i64, tpu.core_type = #tpu.core_type<tc>, window_params = [{pipeline_mode = #tpu.pipeline_mode<synchronous>, transform_indices = @transform_0, window_bounds = array<i64: 64, 2>}, {transform_indices = @transform_1, window_bounds = array<i64: 1, 64, 512>}, {pipeline_mode = #tpu.pipeline_mode<synchronous>, transform_indices = @transform_2, window_bounds = array<i64: 64, 2>}]} {
    %c0_i32 = arith.constant 0 : i32
    %0 = arith.cmpi eq, %arg0, %c0_i32 : i32
    %c0_i32_0 = arith.constant 0 : i32
    %1 = arith.cmpi eq, %arg1, %c0_i32_0 : i32
    %2 = arith.andi %0, %1 : i1
    %c1_i32 = arith.constant 1 : i32
    %3 = arith.cmpi eq, %arg0, %c1_i32 : i32
    %c1_i32_1 = arith.constant 1 : i32
    %4 = arith.cmpi eq, %arg1, %c1_i32_1 : i32
    %5 = arith.andi %3, %4 : i1
    %6 = arith.extui %2 : i1 to i32
    %c0_i32_2 = arith.constant 0 : i32
    %7 = arith.cmpi ne, %6, %c0_i32_2 : i32
    scf.if %7 {
      %cst = arith.constant 0.000000e+00 : f32
      %19 = vector.broadcast %cst : f32 to vector<64x512xf32>
      %c0_14 = arith.constant 0 : index
      %c0_15 = arith.constant 0 : index
      %20 = vector.load %arg5[%c0_14, %c0_15] : memref<64x512xf32, #tpu.memory_space<vmem>>, vector<64x512xf32>
      tpu.vector_store %arg5[%c0_14, %c0_15], %19 {strides = array<i32>} : memref<64x512xf32, #tpu.memory_space<vmem>>, vector<64x512xf32>,
      %cst_16 = arith.constant 0.000000e+00 : f32
      %21 = vector.broadcast %cst_16 : f32 to vector<64x512xf32>
      %c0_17 = arith.constant 0 : index
      %c0_18 = arith.constant 0 : index
      %22 = vector.load %arg6[%c0_17, %c0_18] : memref<64x512xf32, #tpu.memory_space<vmem>>, vector<64x512xf32>
      tpu.vector_store %arg6[%c0_17, %c0_18], %21 {strides = array<i32>} : memref<64x512xf32, #tpu.memory_space<vmem>>, vector<64x512xf32>,
    } else {
    }
    %c0 = arith.constant 0 : index
    %c0_3 = arith.constant 0 : index
    %c0_4 = arith.constant 0 : index
    %8 = vector.load %arg3[%c0, %c0_3, %c0_4] : memref<1x64x512xf32, #tpu.memory_space<vmem>>, vector<1x64x512xf32>
    %9 = vector.shape_cast %8 : vector<1x64x512xf32> to vector<64x512xf32>
    %c0_5 = arith.constant 0 : index
    %c0_6 = arith.constant 0 : index
    %10 = vector.load %arg5[%c0_5, %c0_6] : memref<64x512xf32, #tpu.memory_space<vmem>>, vector<64x512xf32>
    %11 = arith.addf %10, %9 : vector<64x512xf32>
    %c0_7 = arith.constant 0 : index
    %c0_8 = arith.constant 0 : index
    %12 = vector.load %arg5[%c0_7, %c0_8] : memref<64x512xf32, #tpu.memory_space<vmem>>, vector<64x512xf32>
    tpu.vector_store %arg5[%c0_7, %c0_8], %11 {strides = array<i32>} : memref<64x512xf32, #tpu.memory_space<vmem>>, vector<64x512xf32>,
    %c0_9 = arith.constant 0 : index
    %c0_10 = arith.constant 0 : index
    %13 = vector.load %arg6[%c0_9, %c0_10] : memref<64x512xf32, #tpu.memory_space<vmem>>, vector<64x512xf32>
    %14 = arith.mulf %9, %9 : vector<64x512xf32>
    %15 = arith.addf %13, %14 : vector<64x512xf32>
    %c0_11 = arith.constant 0 : index
    %c0_12 = arith.constant 0 : index
    %16 = vector.load %arg6[%c0_11, %c0_12] : memref<64x512xf32, #tpu.memory_space<vmem>>, vector<64x512xf32>
    tpu.vector_store %arg6[%c0_11, %c0_12], %15 {strides = array<i32>} : memref<64x512xf32, #tpu.memory_space<vmem>>, vector<64x512xf32>,
    %17 = arith.extui %5 : i1 to i32
    %c0_i32_13 = arith.constant 0 : i32
    %18 = arith.cmpi ne, %17, %c0_i32_13 : i32
    scf.if %18 {
      %c0_14 = arith.constant 0 : index
      %c0_15 = arith.constant 0 : index
      %19 = vector.load %arg5[%c0_14, %c0_15] : memref<64x512xf32, #tpu.memory_space<vmem>>, vector<64x512xf32>
      %cst = arith.constant dense<0.000000e+00> : vector<64xf32>
      %20 = vector.multi_reduction <add>, %19, %cst [1] : vector<64x512xf32> to vector<64xf32>
      %21 = vector.shape_cast %20 : vector<64xf32> to vector<64x1xf32>
      %c0_16 = arith.constant 0 : index
      %c0_17 = arith.constant 0 : index
      %22 = vector.load %arg6[%c0_16, %c0_17] : memref<64x512xf32, #tpu.memory_space<vmem>>, vector<64x512xf32>
      %cst_18 = arith.constant dense<0.000000e+00> : vector<64xf32>
      %23 = vector.multi_reduction <add>, %22, %cst_18 [1] : vector<64x512xf32> to vector<64xf32>
      %24 = vector.shape_cast %23 : vector<64xf32> to vector<64x1xf32>
      %cst_19 = arith.constant 4.8828125E-4 : f32
      %25 = vector.broadcast %cst_19 : f32 to vector<64x1xf32>
      %26 = arith.mulf %21, %25 : vector<64x1xf32>
      %cst_20 = arith.constant 4.8828125E-4 : f32
      %27 = vector.broadcast %cst_20 : f32 to vector<64x1xf32>
      %28 = arith.mulf %24, %27 : vector<64x1xf32>
      %29 = arith.mulf %26, %26 : vector<64x1xf32>
      %30 = arith.subf %28, %29 : vector<64x1xf32>
      %cst_21 = arith.constant 0.000000e+00 : f32
      %31 = vector.broadcast %cst_21 : f32 to vector<64x1xf32>
      %32 = arith.maximumf %30, %31 : vector<64x1xf32>
      %cst_22 = arith.constant 9.99999974E-6 : f32
      %33 = vector.broadcast %cst_22 : f32 to vector<64x1xf32>
      %34 = arith.addf %32, %33 : vector<64x1xf32>
      %35 = math.rsqrt %34 : vector<64x1xf32>
      %c0_23 = arith.constant 0 : index
      %c0_24 = arith.constant 0 : index
      %36 = vector.load %arg2[%c0_23, %c0_24] : memref<64x2xf32, #tpu.memory_space<vmem>>, vector<64x2xf32>
      %37 = vector.extract_strided_slice %36 {offsets = [0, 0], sizes = [64, 1], strides = [1, 1]} : vector<64x2xf32> to vector<64x1xf32>
      %38 = vector.extract_strided_slice %36 {offsets = [0, 1], sizes = [64, 1], strides = [1, 1]} : vector<64x2xf32> to vector<64x1xf32>
      %39 = arith.mulf %35, %37 : vector<64x1xf32>
      %40 = arith.mulf %26, %39 : vector<64x1xf32>
      %41 = arith.subf %38, %40 : vector<64x1xf32>
      %c0_25 = arith.constant 0 : index
      %c0_26 = arith.constant 0 : index
      %42 = vector.load %arg4[%c0_25, %c0_26] : memref<64x2xf32, #tpu.memory_space<vmem>>, vector<64x1xf32>
      tpu.vector_store %arg4[%c0_25, %c0_26], %39 {strides = array<i32>} : memref<64x2xf32, #tpu.memory_space<vmem>>, vector<64x1xf32>,
      %c0_27 = arith.constant 0 : index
      %c1 = arith.constant 1 : index
      %43 = vector.load %arg4[%c0_27, %c1] : memref<64x2xf32, #tpu.memory_space<vmem>>, vector<64x1xf32>
      tpu.vector_store %arg4[%c0_27, %c1], %41 {strides = array<i32>} : memref<64x2xf32, #tpu.memory_space<vmem>>, vector<64x1xf32>,
    } else {
    }
    return
  }
  func.func @transform_0(%arg0: i32, %arg1: i32) -> (i32, i32) {
    %c0_i32 = arith.constant 0 : i32
    %c0_i32_0 = arith.constant 0 : i32
    %c0_i32_1 = arith.constant 0 : i32
    return %c0_i32, %c0_i32_0 : i32, i32
  }
  func.func @transform_1(%arg0: i32, %arg1: i32) -> (i32, i32, i32) {
    %c0_i32 = arith.constant 0 : i32
    %c0_i32_0 = arith.constant 0 : i32
    return %arg0, %c0_i32, %arg1 : i32, i32, i32
  }
  func.func @transform_2(%arg0: i32, %arg1: i32) -> (i32, i32) {
    %c0_i32 = arith.constant 0 : i32
    %c0_i32_0 = arith.constant 0 : i32
    %c0_i32_1 = arith.constant 0 : i32
    return %c0_i32, %c0_i32_0 : i32, i32
  }
}

</mosaic_0001>

<bundles_post_ra>
// kernel: tpu_custom_call.1
= control target key start
LH: loop header
LB: loop body
LE: loop exit
PB: predicated region body
PF: predicated region fallthrough
CT: control target
= control target key end

     0   :  { %7 = vsyncpa [#allocation5], 0  ;;  %s1638_s0 = inlined_call_operand.vmem [shape: f32[64,2], index: 0, kind: input, shape index: {}]   ;;  %s1639_s1 = inlined_call_operand.hbm [shape: f32[2,64,1024], index: 1, kind: input, shape index: {}]   ;;  %s1640_s2 = inlined_call_operand.vmem [shape: f32[64,2], index: 2, kind: output, shape index: {}]  }
   0x1   :  { %9 = vsyncpa [#allocation5 + $0x1], 0  ;;  %s1056_s9 = smov 0   ;;  %s1058_s10 = smov 0  }
   0x2   :  { %s1060_s11 = smov 0   ;;  %s1062_s12 = smov 0  }
   0x3   :  { %s1064_s13 = smov 0   ;;  %s1066_s14 = smov 0  }
   0x4   :  { %s1068_s15 = smov 0   ;;  %s1070_s16 = smov 0  }
   0x5 LB: > { %s834_s17 = sadd.s32 4294967295, %s1033_s16   ;;  %s24_s18 = sadd.s32 1, %s1025_s14  ;;  %s1033_s16 = sphi %s1070_s16, %s15_s16   ;;  %s1029_s15 = sphi %s1068_s15, %s1651_s15   ;;  %s1025_s14 = sphi %s1066_s14, %s1650_s14   ;;  %s1021_s13 = sphi %s1064_s13, %s1649_s13   ;;  %s1017_s12 = sphi %s1062_s12, %s1648_s12   ;;  %s1013_s11 = sphi %s1060_s11, %s1647_s11   ;;  %s1009_s10 = sphi %s1058_s10, %s1646_s10   ;;  %s1005_s9 = sphi %s1056_s9, %s1645_s9  }
   0x6   : > { %p25_p0 = scmp.ge.s32.totalorder %s24_s18, 2  ;;  %s27_s19 = sadd.s32 1, %s1029_s15 }
   0x7   : > { %s57_s20 = sadd.s32 1, %s1013_s11  ;;  %p64_p1 = scmp.ne.s32.totalorder %s1013_s11, %s1009_s10 }
   0x8   : > { %s1653_s18 = smov (%p25_p0, %s24_s18), 0  ;;  %s1655_s19 = smov (!%p25_p0, %s27_s19), %s1029_s15 }
   0x9   : > { %s53_s21 = ssub.s32 %s1025_s14, %s1653_s18  ;;  %p65_p2 = scmp.eq.s32.totalorder %s1033_s16, 0 }
   0xa   : > { %p29_p3 = scmp.ge.s32.totalorder %s1655_s19, 2  ;;  %p70_p4 = scmp.ne.s32.totalorder %s1009_s10, %s1005_s9 }
   0xb   : > { %p1107_p5 = por %p65_p2, %p64_p1  ;;  %p71_p6 = scmp.eq.s32.totalorder %s834_s17, 0 }
   0xc   : > { %s1657_s19 = smov (%p29_p3, %s1655_s19), 0  ;;  %p851_p8 = scmp.lt.s32.totalorder %s1033_s16, 4 }
   0xd   : > { %p1113_p7 = por %p71_p6, %p70_p4  ;;  %s52_s24 = ssub.s32 %s1029_s15, %s1657_s19 }
   0xe   : > { %s54_s25 = sor.u32 %s53_s21, %s52_s24  ;;  %s118_s26 = sand.u32 1, %s1013_s11  }
   0xf   : > { %p55_p9 = scmp.eq.s32.totalorder %s54_s25, 0  ;;  %s837_s27 = sshll.u32 %s118_s26, 8 }
  0x10   : > { %s838_s28 = sshll.u32 %s1025_s14, 2  ;;  %s839_s30 = sshll.u32 %s1029_s15, 6 }
  0x11   : > { %s1123_s29 = scalar_select %p55_p9, %s1013_s11, %s57_s20  }
  0x12   : > { %s128_s3 = sadd.s32 %s839_s30, %s838_s28  ;;  %s122_s4 = scalar_lea.vmem [#allocation4], %s837_s27 }
  0x13   : > { %s131_s5 = sshll.u32 %s122_s4, 4  ;;  %s840_s6 = sshll.u32 %s128_s3, 7  ;;  %s1126_s5 = int_to_ptr.vmem [resolvable:$true] %s131_s5 }
  0x14   : > { %s1131_s9 = scalar_lea.hbm %s1639_s1, %s840_s6  ;;  %p1137_p10 = pnand %p851_p8, %p1107_p5 }
  0x15   : > { %s1141_s20 = scalar_lea.sflag [#allocation5], %s118_s26  ;;  %s937_s21 = scalar_lea.hbm %s1131_s9, 4096 }
  0x16   : > { %p938_p11 = scmp.ne.s32.totalorder %s1131_s9, %s937_s21  ;;  %p939_p12 = pneg %p1137_p10 }
  0x17   : > { %s942_s25 = scalar_lea.hbm %s1639_s1, 16384  ;;  %p943_p1 = scmp.lt.u32.totalorder %s1131_s9, %s1639_s1 }
  0x18   : > { %p940_p13 = pnand %p939_p12, %p938_p11  ;;  %p944_p2 = scmp.lt.u32.totalorder %s942_s25, %s937_s21 }
  0x19   : > { %p946_p4 = scmp.lt.u32.totalorder %s937_s21, %s1131_s9 }
  0x1a   : > { %p941_p0 = pneg %p940_p13  ;;  %p945_p3 = por %p944_p2, %p943_p1 }
  0x1c   : > { %p947_p5 = por %p946_p4, %p945_p3 }
  0x1e   : > { %p948_p6 = pnand %p947_p5, %p941_p0 }
  0x20   : > { %951 = shalt.err (!%p948_p6)
}
  0x21   : > { %s952_s26 = scalar_lea.vmem %s1126_s5, 4096  ;;  %s1035_s30 = smov [#allocation4]  }
  0x22   : > { %p953_p8 = scmp.ne.s32.totalorder %s1126_s5, %s952_s26  ;;  %s957_s3 = sshll.u32 %s1035_s30, 4  ;;  %s958_s3 = int_to_ptr.vmem [resolvable:$false] %s957_s3 }
  0x23   : > { %s959_s4 = scalar_lea.vmem %s958_s3, 8192  ;;  %p960_p13 = scmp.lt.s32.totalorder %s1126_s5, %s958_s3 }
  0x24   : > { %p955_p9 = pnand %p953_p8, %p939_p12  ;;  %p961_p1 = scmp.lt.s32.totalorder %s959_s4, %s952_s26 }
  0x26   : > { %p956_p11 = pneg %p955_p9  ;;  %p962_p2 = por %p961_p1, %p960_p13 }
  0x28   : > { %p963_p3 = pnand %p962_p2, %p956_p11 }
  0x2a   : > { %966 = shalt.err (!%p963_p3)
}
  0x2b   : > { %s1036_s6 = smov 1024   ;;  %s1037_s7 = smov 512  }
  0x2c   : > { %s1038_s8 = smov 32   ;;  %p841_p12 = scmp.ge.s32.totalorder %s1033_s16, 1 }
  0x2d   : > { %850 = dma.hbm_to_vmem [thread:$0]  (!%p1137_p10), %s1131_s9, 4096, %s1126_s5, %s1141_s20, %s1036_s6, %s1037_s7, %s1038_s8  }
  0x2e   : > { %p139_p0 = scmp.lt.s32.totalorder %s1033_s16, 5 }
  0x30   : > { %p140_p4 = pnand %p841_p12, %p139_p0 }
  0x31   : > { %s145_s21 = sand.u32 (!%p140_p4), 1, %s1009_s10  }
  0x32   : > { %143 = sbr.rel (%p140_p4) target bundleno = 457 (0x1c9), region = 28  ;;  %s842_s22 = sshll.u32 (!%p140_p4), %s145_s21, 8 }
  0x33   : > { %s146_s24 = scalar_lea.sflag (!%p140_p4), [#allocation5], %s145_s21  ;;  %s1172_s25 = scalar_lea.vmem (!%p140_p4), [#allocation4], %s842_s22 }
  0x39   : > { %1000 = dma.done.wait (%p1113_p7), %s146_s24, 4096  }
  0x3a   : > { %1002 = vsyncadd (%p1113_p7), %s146_s24, 4294963200  ;;  %p166_p10 = scmp.eq.s32.totalorder %s1021_s13, 0  ;;  %p167_p5 = scmp.eq.s32.totalorder %s1017_s12, 0 }
  0x3b   : > { %p170_p6 = scmp.eq.s32.totalorder %s1021_s13, 1  ;;  %p171_p8 = scmp.eq.s32.totalorder %s1017_s12, 1 }
  0x3c   : > { %p168_p9 = pnand %p167_p5, %p166_p10 }
  0x3d   : > { %p1182_p11 = pnand %p171_p8, %p170_p6  ;;  %v1039_v0 = vmov (!%p168_p9), 0.0  }
  0x3e   : > { %175 = sbr.rel (%p168_p9) target bundleno = 94 (0x5e), region = 36  ;;  %176 = vst [vmem:[#allocation2] sm:$0xff] (!%p168_p9), %v1039_v0  ;;  %177 = vst [vmem:[#allocation2 + $0x8] sm:$0xff] (!%p168_p9), %v1039_v0 }
  0x3f   : > { %178 = vst [vmem:[#allocation2 + $0x10] sm:$0xff] (!%p168_p9), %v1039_v0  ;;  %179 = vst [vmem:[#allocation2 + $0x18] sm:$0xff] (!%p168_p9), %v1039_v0 }
  0x40   : > { %180 = vst [vmem:[#allocation2 + $0x20] sm:$0xff] (!%p168_p9), %v1039_v0  ;;  %181 = vst [vmem:[#allocation2 + $0x28] sm:$0xff] (!%p168_p9), %v1039_v0 }
  0x41   : > { %182 = vst [vmem:[#allocation2 + $0x30] sm:$0xff] (!%p168_p9), %v1039_v0  ;;  %183 = vst [vmem:[#allocation2 + $0x38] sm:$0xff] (!%p168_p9), %v1039_v0 }
  0x42   : > { %184 = vst [vmem:[#allocation2 + $0x40] sm:$0xff] (!%p168_p9), %v1039_v0  ;;  %185 = vst [vmem:[#allocation2 + $0x48] sm:$0xff] (!%p168_p9), %v1039_v0 }
  0x43   : > { %186 = vst [vmem:[#allocation2 + $0x50] sm:$0xff] (!%p168_p9), %v1039_v0  ;;  %187 = vst [vmem:[#allocation2 + $0x58] sm:$0xff] (!%p168_p9), %v1039_v0 }
  0x44   : > { %188 = vst [vmem:[#allocation2 + $0x60] sm:$0xff] (!%p168_p9), %v1039_v0  ;;  %189 = vst [vmem:[#allocation2 + $0x68] sm:$0xff] (!%p168_p9), %v1039_v0 }
  0x45   : > { %190 = vst [vmem:[#allocation2 + $0x70] sm:$0xff] %v1039_v0  ;;  %191 = vst [vmem:[#allocation2 + $0x78] sm:$0xff] %v1039_v0 }
  0x46   : > { %192 = vst [vmem:[#allocation2 + $0x80] sm:$0xff] %v1039_v0  ;;  %193 = vst [vmem:[#allocation2 + $0x88] sm:$0xff] %v1039_v0 }
  0x47   : > { %194 = vst [vmem:[#allocation2 + $0x90] sm:$0xff] %v1039_v0  ;;  %195 = vst [vmem:[#allocation2 + $0x98] sm:$0xff] %v1039_v0 }
  0x48   : > { %196 = vst [vmem:[#allocation2 + $0xa0] sm:$0xff] %v1039_v0  ;;  %197 = vst [vmem:[#allocation2 + $0xa8] sm:$0xff] %v1039_v0 }
  0x49   : > { %198 = vst [vmem:[#allocation2 + $0xb0] sm:$0xff] %v1039_v0  ;;  %199 = vst [vmem:[#allocation2 + $0xb8] sm:$0xff] %v1039_v0 }
  0x4a   : > { %200 = vst [vmem:[#allocation2 + $0xc0] sm:$0xff] %v1039_v0  ;;  %201 = vst [vmem:[#allocation2 + $0xc8] sm:$0xff] %v1039_v0 }
  0x4b   : > { %202 = vst [vmem:[#allocation2 + $0xd0] sm:$0xff] %v1039_v0  ;;  %203 = vst [vmem:[#allocation2 + $0xd8] sm:$0xff] %v1039_v0 }
  0x4c   : > { %204 = vst [vmem:[#allocation2 + $0xe0] sm:$0xff] %v1039_v0  ;;  %205 = vst [vmem:[#allocation2 + $0xe8] sm:$0xff] %v1039_v0 }
  0x4d   : > { %206 = vst [vmem:[#allocation2 + $0xf0] sm:$0xff] %v1039_v0  ;;  %207 = vst [vmem:[#allocation2 + $0xf8] sm:$0xff] %v1039_v0 }
  0x4e   : > { %208 = vst [vmem:[#allocation3] sm:$0xff] %v1039_v0  ;;  %209 = vst [vmem:[#allocation3 + $0x8] sm:$0xff] %v1039_v0 }
  0x4f   : > { %210 = vst [vmem:[#allocation3 + $0x10] sm:$0xff] %v1039_v0  ;;  %211 = vst [vmem:[#allocation3 + $0x18] sm:$0xff] %v1039_v0 }
  0x50   : > { %212 = vst [vmem:[#allocation3 + $0x20] sm:$0xff] %v1039_v0  ;;  %213 = vst [vmem:[#allocation3 + $0x28] sm:$0xff] %v1039_v0 }
  0x51   : > { %214 = vst [vmem:[#allocation3 + $0x30] sm:$0xff] %v1039_v0  ;;  %215 = vst [vmem:[#allocation3 + $0x38] sm:$0xff] %v1039_v0 }
  0x52   : > { %216 = vst [vmem:[#allocation3 + $0x40] sm:$0xff] %v1039_v0  ;;  %217 = vst [vmem:[#allocation3 + $0x48] sm:$0xff] %v1039_v0 }
  0x53   : > { %218 = vst [vmem:[#allocation3 + $0x50] sm:$0xff] %v1039_v0  ;;  %219 = vst [vmem:[#allocation3 + $0x58] sm:$0xff] %v1039_v0 }
  0x54   : > { %220 = vst [vmem:[#allocation3 + $0x60] sm:$0xff] %v1039_v0  ;;  %221 = vst [vmem:[#allocation3 + $0x68] sm:$0xff] %v1039_v0 }
  0x55   : > { %222 = vst [vmem:[#allocation3 + $0x70] sm:$0xff] %v1039_v0  ;;  %223 = vst [vmem:[#allocation3 + $0x78] sm:$0xff] %v1039_v0 }
  0x56   : > { %224 = vst [vmem:[#allocation3 + $0x80] sm:$0xff] %v1039_v0  ;;  %225 = vst [vmem:[#allocation3 + $0x88] sm:$0xff] %v1039_v0 }
  0x57   : > { %226 = vst [vmem:[#allocation3 + $0x90] sm:$0xff] %v1039_v0  ;;  %227 = vst [vmem:[#allocation3 + $0x98] sm:$0xff] %v1039_v0 }
  0x58   : > { %228 = vst [vmem:[#allocation3 + $0xa0] sm:$0xff] %v1039_v0  ;;  %229 = vst [vmem:[#allocation3 + $0xa8] sm:$0xff] %v1039_v0 }
  0x59   : > { %230 = vst [vmem:[#allocation3 + $0xb0] sm:$0xff] %v1039_v0  ;;  %231 = vst [vmem:[#allocation3 + $0xb8] sm:$0xff] %v1039_v0 }
  0x5a   : > { %232 = vst [vmem:[#allocation3 + $0xc0] sm:$0xff] %v1039_v0  ;;  %233 = vst [vmem:[#allocation3 + $0xc8] sm:$0xff] %v1039_v0 }
  0x5b   : > { %234 = vst [vmem:[#allocation3 + $0xd0] sm:$0xff] %v1039_v0  ;;  %235 = vst [vmem:[#allocation3 + $0xd8] sm:$0xff] %v1039_v0 }
  0x5c   : > { %236 = vst [vmem:[#allocation3 + $0xe0] sm:$0xff] %v1039_v0  ;;  %237 = vst [vmem:[#allocation3 + $0xe8] sm:$0xff] %v1039_v0 }
  0x5d   : > { %238 = vst [vmem:[#allocation3 + $0xf0] sm:$0xff] %v1039_v0  ;;  %239 = vst [vmem:[#allocation3 + $0xf8] sm:$0xff] %v1039_v0 }
  0x5e PF: > { %v1251_v1 = vld [vmem:[%s1172_s25] sm:$0xff]  ;;  %v1254_v3 = vld [vmem:[%s1172_s25 + $0x8] sm:$0xff]  ;;  %v1258_v6 = vld [vmem:[%s1172_s25 + $0x10] sm:$0xff]  ;;  %vm762_vm0 = vcmask (!%p1182_p11), 7168   ;;  %s1040_s6 = smov (!%p1182_p11), 1   ;;  %vm771_vm1 = vcmask (!%p1182_p11), 15368  }
  0x5f   : > { %v272_v2 = vld [vmem:[#allocation2] sm:$0xff]  ;;  %v273_v5 = vld [vmem:[#allocation2 + $0x8] sm:$0xff]  ;;  %v274_v7 = vld [vmem:[#allocation2 + $0x10] sm:$0xff]  ;;  %v1326_v58 = vmul.f32 %v1251_v1, %v1251_v1  ;;  %v1330_v59 = vmul.f32 %v1254_v3, %v1254_v3  ;;  %v1335_v0 = vmul.f32 %v1258_v6, %v1258_v6 }
  0x60   : > { %v304_v4 = vadd.f32 %v272_v2, %v1251_v1  ;;  %v305_v8 = vadd.f32 %v273_v5, %v1254_v3  ;;  %v306_v9 = vadd.f32 %v274_v7, %v1258_v6  ;;  %v1263_v10 = vld [vmem:[%s1172_s25 + $0x18] sm:$0xff]  ;;  %v1266_v12 = vld [vmem:[%s1172_s25 + $0x20] sm:$0xff]  ;;  %v1270_v15 = vld [vmem:[%s1172_s25 + $0x28] sm:$0xff] }
  0x61   : > { %v275_v11 = vld [vmem:[#allocation2 + $0x18] sm:$0xff]  ;;  %v276_v14 = vld [vmem:[#allocation2 + $0x20] sm:$0xff]  ;;  %v277_v16 = vld [vmem:[#allocation2 + $0x28] sm:$0xff]  ;;  %v1339_v2 = vmul.f32 %v1263_v10, %v1263_v10  ;;  %v1343_v1 = vmul.f32 %v1266_v12, %v1266_v12  ;;  %v1349_v6 = vmul.f32 %v1270_v15, %v1270_v15 }
  0x62   : > { %336 = vst [vmem:[#allocation2] sm:$0xff] %v304_v4  ;;  %v307_v13 = vadd.f32 %v275_v11, %v1263_v10  ;;  %337 = vst [vmem:[#allocation2 + $0x8] sm:$0xff] %v305_v8  ;;  %v308_v17 = vadd.f32 %v276_v14, %v1266_v12  ;;  %v309_v18 = vadd.f32 %v277_v16, %v1270_v15  ;;  %v1275_v19 = vld [vmem:[%s1172_s25 + $0x30] sm:$0xff]  ;;  %v1278_v21 = vld [vmem:[%s1172_s25 + $0x38] sm:$0xff] }
  0x63   : > { %338 = vst [vmem:[#allocation2 + $0x10] sm:$0xff] %v306_v9  ;;  %v278_v20 = vld [vmem:[#allocation2 + $0x30] sm:$0xff]  ;;  %v279_v23 = vld [vmem:[#allocation2 + $0x38] sm:$0xff]  ;;  %v1282_v24 = vld [vmem:[%s1172_s25 + $0x40] sm:$0xff]  ;;  %v1353_v9 = vmul.f32 %v1275_v19, %v1275_v19  ;;  %v1358_v14 = vmul.f32 %v1278_v21, %v1278_v21 }
  0x64   : > { %339 = vst [vmem:[#allocation2 + $0x18] sm:$0xff] %v307_v13  ;;  %v310_v22 = vadd.f32 %v278_v20, %v1275_v19  ;;  %v280_v25 = vld [vmem:[#allocation2 + $0x40] sm:$0xff]  ;;  %340 = vst [vmem:[#allocation2 + $0x20] sm:$0xff] %v308_v17  ;;  %v311_v26 = vadd.f32 %v279_v23, %v1278_v21  ;;  %v1287_v28 = vld [vmem:[%s1172_s25 + $0x48] sm:$0xff]  ;;  %v1362_v16 = vmul.f32 %v1282_v24, %v1282_v24 }
  0x65   : > { %341 = vst [vmem:[#allocation2 + $0x28] sm:$0xff] %v309_v18  ;;  %v312_v27 = vadd.f32 %v280_v25, %v1282_v24  ;;  %v281_v29 = vld [vmem:[#allocation2 + $0x48] sm:$0xff]  ;;  %v1290_v30 = vld [vmem:[%s1172_s25 + $0x50] sm:$0xff]  ;;  %v1294_v33 = vld [vmem:[%s1172_s25 + $0x58] sm:$0xff]  ;;  %v1366_v15 = vmul.f32 %v1287_v28, %v1287_v28 }
  0x66   : > { %342 = vst [vmem:[#allocation2 + $0x30] sm:$0xff] %v310_v22  ;;  %v313_v31 = vadd.f32 %v281_v29, %v1287_v28  ;;  %v282_v32 = vld [vmem:[#allocation2 + $0x50] sm:$0xff]  ;;  %v283_v34 = vld [vmem:[#allocation2 + $0x58] sm:$0xff]  ;;  %343 = vst [vmem:[#allocation2 + $0x38] sm:$0xff] %v311_v26  ;;  %v1372_v21 = vmul.f32 %v1290_v30, %v1290_v30  ;;  %v1376_v23 = vmul.f32 %v1294_v33, %v1294_v33 }
  0x67   : > { %344 = vst [vmem:[#allocation2 + $0x40] sm:$0xff] %v312_v27  ;;  %v314_v35 = vadd.f32 %v282_v32, %v1290_v30  ;;  %v315_v36 = vadd.f32 %v283_v34, %v1294_v33  ;;  %v1299_v37 = vld [vmem:[%s1172_s25 + $0x60] sm:$0xff]  ;;  %v1302_v39 = vld [vmem:[%s1172_s25 + $0x68] sm:$0xff]  ;;  %v1306_v42 = vld [vmem:[%s1172_s25 + $0x70] sm:$0xff] }
  0x68   : > { %v284_v38 = vld [vmem:[#allocation2 + $0x60] sm:$0xff]  ;;  %345 = vst [vmem:[#allocation2 + $0x48] sm:$0xff] %v313_v31  ;;  %v285_v41 = vld [vmem:[#allocation2 + $0x68] sm:$0xff]  ;;  %v286_v43 = vld [vmem:[#allocation2 + $0x70] sm:$0xff]  ;;  %v1381_v28 = vmul.f32 %v1299_v37, %v1299_v37  ;;  %v1385_v29 = vmul.f32 %v1302_v39, %v1302_v39  ;;  %v1389_v30 = vmul.f32 %v1306_v42, %v1306_v42 }
  0x69   : > { %v316_v40 = vadd.f32 %v284_v38, %v1299_v37  ;;  %346 = vst [vmem:[#allocation2 + $0x50] sm:$0xff] %v314_v35  ;;  %347 = vst [vmem:[#allocation2 + $0x58] sm:$0xff] %v315_v36  ;;  %v317_v44 = vadd.f32 %v285_v41, %v1302_v39  ;;  %v318_v45 = vadd.f32 %v286_v43, %v1306_v42  ;;  %v1311_v46 = vld [vmem:[%s1172_s25 + $0x78] sm:$0xff]  ;;  %v1314_v48 = vld [vmem:[%s1172_s25 + $0x80] sm:$0xff] }
  0x6a   : > { %v287_v47 = vld [vmem:[#allocation2 + $0x78] sm:$0xff]  ;;  %v288_v50 = vld [vmem:[#allocation2 + $0x80] sm:$0xff]  ;;  %v1318_v51 = vld [vmem:[%s1172_s25 + $0x88] sm:$0xff]  ;;  %v1397_v36 = vmul.f32 %v1311_v46, %v1311_v46  ;;  %v1401_v37 = vmul.f32 %v1314_v48, %v1314_v48 }
  0x6b   : > { %348 = vst [vmem:[#allocation2 + $0x60] sm:$0xff] %v316_v40  ;;  %v319_v49 = vadd.f32 %v287_v47, %v1311_v46  ;;  %v289_v52 = vld [vmem:[#allocation2 + $0x88] sm:$0xff]  ;;  %349 = vst [vmem:[#allocation2 + $0x68] sm:$0xff] %v317_v44  ;;  %v320_v53 = vadd.f32 %v288_v50, %v1314_v48  ;;  %v258_v55 = vld [vmem:[%s1172_s25 + $0x90] sm:$0xff]  ;;  %v1408_v42 = vmul.f32 %v1318_v51, %v1318_v51 }
  0x6c   : > { %350 = vst [vmem:[#allocation2 + $0x70] sm:$0xff] %v318_v45  ;;  %v321_v54 = vadd.f32 %v289_v52, %v1318_v51  ;;  %v290_v56 = vld [vmem:[#allocation2 + $0x90] sm:$0xff]  ;;  %v259_v57 = vld [vmem:[%s1172_s25 + $0x98] sm:$0xff]  ;;  %v260_v62 = vld [vmem:[%s1172_s25 + $0xa0] sm:$0xff]  ;;  %v1410_v43 = vmul.f32 %v258_v55, %v258_v55 }
  0x6d   : > { %351 = vst [vmem:[#allocation2 + $0x78] sm:$0xff] %v319_v49  ;;  %v322_v60 = vadd.f32 %v290_v56, %v258_v55  ;;  %v291_v61 = vld [vmem:[#allocation2 + $0x98] sm:$0xff]  ;;  %v292_v63 = vld [vmem:[#allocation2 + $0xa0] sm:$0xff]  ;;  %352 = vst [vmem:[#allocation2 + $0x80] sm:$0xff] %v320_v53  ;;  %v1412_v44 = vmul.f32 %v259_v57, %v259_v57  ;;  %v1422_v50 = vmul.f32 %v260_v62, %v260_v62 }
  0x6e   : > { %353 = vst [vmem:[#allocation2 + $0x88] sm:$0xff] %v321_v54  ;;  %v323_v3 = vadd.f32 %v291_v61, %v259_v57  ;;  %v324_v4 = vadd.f32 %v292_v63, %v260_v62  ;;  %v261_v5 = vld [vmem:[%s1172_s25 + $0xa8] sm:$0xff]  ;;  %v262_v8 = vld [vmem:[%s1172_s25 + $0xb0] sm:$0xff]  ;;  %v263_v12 = vld [vmem:[%s1172_s25 + $0xb8] sm:$0xff] }
  0x6f   : > { %v293_v7 = vld [vmem:[#allocation2 + $0xa8] sm:$0xff]  ;;  %354 = vst [vmem:[#allocation2 + $0x90] sm:$0xff] %v322_v60  ;;  %v294_v11 = vld [vmem:[#allocation2 + $0xb0] sm:$0xff]  ;;  %v295_v13 = vld [vmem:[#allocation2 + $0xb8] sm:$0xff]  ;;  %v1424_v52 = vmul.f32 %v261_v5, %v261_v5  ;;  %v1427_v56 = vmul.f32 %v262_v8, %v262_v8  ;;  %v1429_v57 = vmul.f32 %v263_v12, %v263_v12 }
  0x70   : > { %v325_v10 = vadd.f32 %v293_v7, %v261_v5  ;;  %355 = vst [vmem:[#allocation2 + $0x98] sm:$0xff] %v323_v3  ;;  %356 = vst [vmem:[#allocation2 + $0xa0] sm:$0xff] %v324_v4  ;;  %v326_v17 = vadd.f32 %v294_v11, %v262_v8  ;;  %v327_v18 = vadd.f32 %v295_v13, %v263_v12  ;;  %v264_v19 = vld [vmem:[%s1172_s25 + $0xc0] sm:$0xff]  ;;  %v265_v22 = vld [vmem:[%s1172_s25 + $0xc8] sm:$0xff] }
  0x71   : > { %v296_v20 = vld [vmem:[#allocation2 + $0xc0] sm:$0xff]  ;;  %v297_v25 = vld [vmem:[#allocation2 + $0xc8] sm:$0xff]  ;;  %v266_v26 = vld [vmem:[%s1172_s25 + $0xd0] sm:$0xff]  ;;  %v1431_v60 = vmul.f32 %v264_v19, %v264_v19  ;;  %v1436_v7 = vmul.f32 %v265_v22, %v265_v22 }
  0x72   : > { %357 = vst [vmem:[#allocation2 + $0xa8] sm:$0xff] %v325_v10  ;;  %v328_v24 = vadd.f32 %v296_v20, %v264_v19  ;;  %v298_v27 = vld [vmem:[#allocation2 + $0xd0] sm:$0xff]  ;;  %358 = vst [vmem:[#allocation2 + $0xb0] sm:$0xff] %v326_v17  ;;  %v329_v31 = vadd.f32 %v297_v25, %v265_v22  ;;  %v267_v33 = vld [vmem:[%s1172_s25 + $0xd8] sm:$0xff] }
  0x73   : > { %359 = vst [vmem:[#allocation2 + $0xb8] sm:$0xff] %v327_v18  ;;  %v330_v32 = vadd.f32 %v298_v27, %v266_v26  ;;  %v299_v34 = vld [vmem:[#allocation2 + $0xd8] sm:$0xff]  ;;  %v1393_v35 = vld [vmem:[%s1172_s25 + $0xe0] sm:$0xff]  ;;  %v1404_v40 = vld [vmem:[%s1172_s25 + $0xe8] sm:$0xff]  ;;  %v1441_v18 = vmul.f32 %v266_v26, %v266_v26 }
  0x74   : > { %360 = vst [vmem:[#allocation2 + $0xc0] sm:$0xff] %v328_v24  ;;  %v331_v38 = vadd.f32 %v299_v34, %v267_v33  ;;  %v300_v39 = vld [vmem:[#allocation2 + $0xe0] sm:$0xff]  ;;  %v301_v41 = vld [vmem:[#allocation2 + $0xe8] sm:$0xff]  ;;  %361 = vst [vmem:[#allocation2 + $0xc8] sm:$0xff] %v329_v31 }
  0x75   : > { %362 = vst [vmem:[#allocation2 + $0xd0] sm:$0xff] %v330_v32  ;;  %v332_v45 = vadd.f32 %v300_v39, %v1393_v35  ;;  %v333_v46 = vadd.f32 %v301_v41, %v1404_v40  ;;  %v1417_v47 = vld [vmem:[%s1172_s25 + $0xf0] sm:$0xff]  ;;  %v1420_v49 = vld [vmem:[%s1172_s25 + $0xf8] sm:$0xff]  ;;  %v368_v54 = vld [vmem:[#allocation3] sm:$0xff] }
  0x76   : > { %v302_v48 = vld [vmem:[#allocation2 + $0xf0] sm:$0xff]  ;;  %363 = vst [vmem:[#allocation2 + $0xd8] sm:$0xff] %v331_v38  ;;  %v303_v53 = vld [vmem:[#allocation2 + $0xf8] sm:$0xff]  ;;  %v369_v55 = vld [vmem:[#allocation3 + $0x8] sm:$0xff]  ;;  %v432_v62 = vadd.f32 %v1326_v58, %v368_v54 }
  0x77   : > { %v334_v51 = vadd.f32 %v302_v48, %v1417_v47  ;;  %364 = vst [vmem:[#allocation2 + $0xe0] sm:$0xff] %v332_v45  ;;  %365 = vst [vmem:[#allocation2 + $0xe8] sm:$0xff] %v333_v46  ;;  %v335_v61 = vadd.f32 %v303_v53, %v1420_v49  ;;  %v433_v63 = vadd.f32 %v1330_v59, %v369_v55  ;;  %v370_v3 = vld [vmem:[#allocation3 + $0x10] sm:$0xff]  ;;  %v371_v4 = vld [vmem:[#allocation3 + $0x18] sm:$0xff] }
  0x78   : > { %v372_v5 = vld [vmem:[#allocation3 + $0x20] sm:$0xff]  ;;  %v434_v8 = vadd.f32 %v1335_v0, %v370_v3  ;;  %v435_v10 = vadd.f32 %v1339_v2, %v371_v4  ;;  %v373_v12 = vld [vmem:[#allocation3 + $0x28] sm:$0xff]  ;;  %v374_v13 = vld [vmem:[#allocation3 + $0x30] sm:$0xff]  ;;  %464 = vst [vmem:[#allocation3] sm:$0xff] %v432_v62  ;;  %v1446_v2 = vmul.f32 %v267_v33, %v267_v33 }
  0x79   : > { %366 = vst [vmem:[#allocation2 + $0xf0] sm:$0xff] %v334_v51  ;;  %v436_v11 = vadd.f32 %v1343_v1, %v372_v5  ;;  %v375_v17 = vld [vmem:[#allocation3 + $0x38] sm:$0xff]  ;;  %367 = vst [vmem:[#allocation2 + $0xf8] sm:$0xff] %v335_v61  ;;  %v437_v58 = vadd.f32 %v1349_v6, %v373_v12  ;;  %v438_v59 = vadd.f32 %v1353_v9, %v374_v13  ;;  %v376_v20 = vld [vmem:[#allocation3 + $0x40] sm:$0xff] }
  0x7a   : > { %465 = vst [vmem:[#allocation3 + $0x8] sm:$0xff] %v433_v63  ;;  %v439_v19 = vadd.f32 %v1358_v14, %v375_v17  ;;  %v377_v0 = vld [vmem:[#allocation3 + $0x48] sm:$0xff]  ;;  %v378_v22 = vld [vmem:[#allocation3 + $0x50] sm:$0xff]  ;;  %466 = vst [vmem:[#allocation3 + $0x10] sm:$0xff] %v434_v8  ;;  %v440_v1 = vadd.f32 %v1362_v16, %v376_v20  ;;  %v428_v9 = vmul.f32 %v1393_v35, %v1393_v35 }
  0x7b   : > { %467 = vst [vmem:[#allocation3 + $0x18] sm:$0xff] %v435_v10  ;;  %468 = vst [vmem:[#allocation3 + $0x20] sm:$0xff] %v436_v11  ;;  %v441_v24 = vadd.f32 %v1366_v15, %v377_v0  ;;  %v442_v25 = vadd.f32 %v1372_v21, %v378_v22  ;;  %v379_v26 = vld [vmem:[#allocation3 + $0x58] sm:$0xff]  ;;  %v380_v6 = vld [vmem:[#allocation3 + $0x60] sm:$0xff]  ;;  %v429_v21 = vmul.f32 %v1404_v40, %v1404_v40 }
  0x7c   : > { %v381_v27 = vld [vmem:[#allocation3 + $0x68] sm:$0xff]  ;;  %469 = vst [vmem:[#allocation3 + $0x28] sm:$0xff] %v437_v58  ;;  %470 = vst [vmem:[#allocation3 + $0x30] sm:$0xff] %v438_v59  ;;  %v443_v14 = vadd.f32 %v1376_v23, %v379_v26  ;;  %v444_v31 = vadd.f32 %v1381_v28, %v380_v6  ;;  %v382_v16 = vld [vmem:[#allocation3 + $0x70] sm:$0xff] }
  0x7d   : > { %471 = vst [vmem:[#allocation3 + $0x38] sm:$0xff] %v439_v19  ;;  %v445_v32 = vadd.f32 %v1385_v29, %v381_v27  ;;  %v383_v33 = vld [vmem:[#allocation3 + $0x78] sm:$0xff]  ;;  %v384_v15 = vld [vmem:[#allocation3 + $0x80] sm:$0xff]  ;;  %472 = vst [vmem:[#allocation3 + $0x40] sm:$0xff] %v440_v1  ;;  %v446_v34 = vadd.f32 %v1389_v30, %v382_v16  ;;  %v430_v29 = vmul.f32 %v1417_v47, %v1417_v47 }
  0x7e   : > { %473 = vst [vmem:[#allocation3 + $0x48] sm:$0xff] %v441_v24  ;;  %474 = vst [vmem:[#allocation3 + $0x50] sm:$0xff] %v442_v25  ;;  %v447_v35 = vadd.f32 %v1397_v36, %v383_v33  ;;  %v448_v38 = vadd.f32 %v1401_v37, %v384_v15  ;;  %v385_v23 = vld [vmem:[#allocation3 + $0x88] sm:$0xff]  ;;  %v386_v39 = vld [vmem:[#allocation3 + $0x90] sm:$0xff]  ;;  %v431_v37 = vmul.f32 %v1420_v49, %v1420_v49 }
  0x7f   : > { %v387_v28 = vld [vmem:[#allocation3 + $0x98] sm:$0xff]  ;;  %475 = vst [vmem:[#allocation3 + $0x58] sm:$0xff] %v443_v14  ;;  %476 = vst [vmem:[#allocation3 + $0x60] sm:$0xff] %v444_v31  ;;  %v449_v40 = vadd.f32 %v1408_v42, %v385_v23  ;;  %v450_v41 = vadd.f32 %v1410_v43, %v386_v39  ;;  %v388_v30 = vld [vmem:[#allocation3 + $0xa0] sm:$0xff] }
  0x80   : > { %477 = vst [vmem:[#allocation3 + $0x68] sm:$0xff] %v445_v32  ;;  %v451_v45 = vadd.f32 %v1412_v44, %v387_v28  ;;  %v389_v46 = vld [vmem:[#allocation3 + $0xa8] sm:$0xff]  ;;  %v390_v36 = vld [vmem:[#allocation3 + $0xb0] sm:$0xff]  ;;  %478 = vst [vmem:[#allocation3 + $0x70] sm:$0xff] %v446_v34  ;;  %v452_v47 = vadd.f32 %v1422_v50, %v388_v30 }
  0x81   : > { %479 = vst [vmem:[#allocation3 + $0x78] sm:$0xff] %v447_v35  ;;  %480 = vst [vmem:[#allocation3 + $0x80] sm:$0xff] %v448_v38  ;;  %v453_v48 = vadd.f32 %v1424_v52, %v389_v46  ;;  %v454_v51 = vadd.f32 %v1427_v56, %v390_v36  ;;  %v391_v42 = vld [vmem:[#allocation3 + $0xb8] sm:$0xff]  ;;  %v392_v53 = vld [vmem:[#allocation3 + $0xc0] sm:$0xff] }
  0x82   : > { %v393_v43 = vld [vmem:[#allocation3 + $0xc8] sm:$0xff]  ;;  %481 = vst [vmem:[#allocation3 + $0x88] sm:$0xff] %v449_v40  ;;  %482 = vst [vmem:[#allocation3 + $0x90] sm:$0xff] %v450_v41  ;;  %v455_v44 = vadd.f32 %v1429_v57, %v391_v42  ;;  %v456_v54 = vadd.f32 %v1431_v60, %v392_v53  ;;  %v394_v55 = vld [vmem:[#allocation3 + $0xd0] sm:$0xff] }
  0x83   : > { %483 = vst [vmem:[#allocation3 + $0x98] sm:$0xff] %v451_v45  ;;  %v457_v49 = vadd.f32 %v1436_v7, %v393_v43  ;;  %v395_v61 = vld [vmem:[#allocation3 + $0xd8] sm:$0xff]  ;;  %v396_v62 = vld [vmem:[#allocation3 + $0xe0] sm:$0xff]  ;;  %484 = vst [vmem:[#allocation3 + $0xa0] sm:$0xff] %v452_v47  ;;  %v458_v50 = vadd.f32 %v1441_v18, %v394_v55  ;;  %497 = sbr.rel (%p1182_p11) target bundleno = 457 (0x1c9), region = 40 }
  0x84   : > { %485 = vst [vmem:[#allocation3 + $0xa8] sm:$0xff] %v453_v48  ;;  %486 = vst [vmem:[#allocation3 + $0xb0] sm:$0xff] %v454_v51  ;;  %v459_v52 = vadd.f32 %v1446_v2, %v395_v61  ;;  %v460_v56 = vadd.f32 %v428_v9, %v396_v62  ;;  %v397_v63 = vld [vmem:[#allocation3 + $0xe8] sm:$0xff]  ;;  %v398_v3 = vld [vmem:[#allocation3 + $0xf0] sm:$0xff] }
  0x85   : > { %v399_v4 = vld [vmem:[#allocation3 + $0xf8] sm:$0xff]  ;;  %487 = vst [vmem:[#allocation3 + $0xb8] sm:$0xff] %v455_v44  ;;  %488 = vst [vmem:[#allocation3 + $0xc0] sm:$0xff] %v456_v54  ;;  %v461_v57 = vadd.f32 %v429_v21, %v397_v63  ;;  %v462_v60 = vadd.f32 %v430_v29, %v398_v3  ;;  %v506_v7 = vld [vmem:[#allocation2 + $0x40] sm:$0xff] (!%p1182_p11) }
  0x86   : > { %489 = vst [vmem:[#allocation3 + $0xc8] sm:$0xff] %v457_v49  ;;  %v463_v5 = vadd.f32 %v431_v37, %v399_v4  ;;  %490 = vst [vmem:[#allocation3 + $0xd0] sm:$0xff] %v458_v50  ;;  %v507_v8 = vld [vmem:[#allocation2 + $0x48] sm:$0xff] (!%p1182_p11)  ;;  %v508_v10 = vld [vmem:[#allocation2 + $0x50] sm:$0xff] (!%p1182_p11) }
  0x87   : > { %491 = vst [vmem:[#allocation3 + $0xd8] sm:$0xff] %v459_v52  ;;  %492 = vst [vmem:[#allocation3 + $0xe0] sm:$0xff] %v460_v56  ;;  %v540_v11 = vadd.f32 (!%p1182_p11), %v507_v8, %v506_v7  ;;  %v498_v12 = vld [vmem:[#allocation2] sm:$0xff] (!%p1182_p11)  ;;  %v499_v13 = vld [vmem:[#allocation2 + $0x8] sm:$0xff] (!%p1182_p11) }
  0x88   : > { %493 = vst [vmem:[#allocation3 + $0xe8] sm:$0xff] %v461_v57  ;;  %494 = vst [vmem:[#allocation3 + $0xf0] sm:$0xff] %v462_v60  ;;  %v509_v17 = vld [vmem:[#allocation2 + $0x58] sm:$0xff] (!%p1182_p11)  ;;  %v500_v18 = vld [vmem:[#allocation2 + $0x10] sm:$0xff] (!%p1182_p11)  ;;  %v530_v58 = vadd.f32 (!%p1182_p11), %v499_v13, %v498_v12 }
  0x89   : > { %495 = vst [vmem:[#allocation3 + $0xf8] sm:$0xff] %v463_v5  ;;  %v510_v59 = vld [vmem:[#allocation2 + $0x60] sm:$0xff] (!%p1182_p11)  ;;  %v541_v19 = vadd.f32 (!%p1182_p11), %v540_v11, %v508_v10  ;;  %v501_v20 = vld [vmem:[#allocation2 + $0x18] sm:$0xff] (!%p1182_p11)  ;;  %v511_v0 = vld [vmem:[#allocation2 + $0x68] sm:$0xff] (!%p1182_p11) }
  0x8a   : > { %v512_v22 = vld [vmem:[#allocation2 + $0x70] sm:$0xff]  ;;  %v531_v2 = vadd.f32 %v530_v58, %v500_v18  ;;  %v545_v1 = vadd.f32 %v511_v0, %v510_v59  ;;  %v502_v24 = vld [vmem:[#allocation2 + $0x20] sm:$0xff]  ;;  %v503_v25 = vld [vmem:[#allocation2 + $0x28] sm:$0xff] }
  0x8b   : > { %v504_v26 = vld [vmem:[#allocation2 + $0x30] sm:$0xff]  ;;  %v542_v6 = vadd.f32 %v541_v19, %v509_v17  ;;  %v513_v27 = vld [vmem:[#allocation2 + $0x78] sm:$0xff]  ;;  %v535_v9 = vadd.f32 %v503_v25, %v502_v24  ;;  %v518_v14 = vld [vmem:[#allocation2 + $0xa0] sm:$0xff] }
  0x8c   : > { %v519_v31 = vld [vmem:[#allocation2 + $0xa8] sm:$0xff]  ;;  %v532_v32 = vadd.f32 %v531_v2, %v501_v20  ;;  %v546_v16 = vadd.f32 %v545_v1, %v512_v22  ;;  %v505_v33 = vld [vmem:[#allocation2 + $0x38] sm:$0xff]  ;;  %v520_v15 = vld [vmem:[#allocation2 + $0xb0] sm:$0xff] }
  0x8d   : > { %v555_v21 = vadd.f32 %v519_v31, %v518_v14  ;;  %v514_v34 = vld [vmem:[#allocation2 + $0x80] sm:$0xff]  ;;  %543 = vadd.xlane.f32.xlu1 %v542_v6  ;;  %v536_v35 = vadd.f32 %v535_v9, %v504_v26  ;;  %v521_v38 = vld [vmem:[#allocation2 + $0xb8] sm:$0xff]  ;;  %v515_v23 = vld [vmem:[#allocation2 + $0x88] sm:$0xff] }
  0x8e   : > { %v516_v39 = vld [vmem:[#allocation2 + $0x90] sm:$0xff]  ;;  %533 = vadd.xlane.f32.xlu0 %v532_v32  ;;  %v547_v28 = vadd.f32 %v546_v16, %v513_v27  ;;  %v550_v40 = vadd.f32 %v515_v23, %v514_v34  ;;  %v526_v41 = vld [vmem:[#allocation2 + $0xe0] sm:$0xff]  ;;  %v527_v45 = vld [vmem:[#allocation2 + $0xe8] sm:$0xff] }
  0x8f   : > { %v556_v29 = vadd.f32 %v555_v21, %v520_v15  ;;  %v528_v30 = vld [vmem:[#allocation2 + $0xf0] sm:$0xff]  ;;  %v537_v46 = vadd.f32 %v536_v35, %v505_v33  ;;  %v517_v36 = vld [vmem:[#allocation2 + $0x98] sm:$0xff]  ;;  %v565_v37 = vadd.f32 %v527_v45, %v526_v41  ;;  %v522_v47 = vld [vmem:[#allocation2 + $0xc0] sm:$0xff] }
  0x90   : > { %v523_v48 = vld [vmem:[#allocation2 + $0xc8] sm:$0xff]  ;;  %v551_v51 = vadd.f32 %v550_v40, %v516_v39  ;;  %v524_v42 = vld [vmem:[#allocation2 + $0xd0] sm:$0xff]  ;;  %v574_v43 = vld [vmem:[#allocation3 + $0x20] sm:$0xff] }
  0x91   : > { %v560_v53 = vadd.f32 %v523_v48, %v522_v47  ;;  %548 = vadd.xlane.f32.xlu1 %v547_v28  ;;  %v557_v44 = vadd.f32 %v556_v29, %v521_v38  ;;  %v529_v54 = vld [vmem:[#allocation2 + $0xf8] sm:$0xff]  ;;  %v566_v49 = vadd.f32 %v565_v37, %v528_v30  ;;  %v575_v61 = vld [vmem:[#allocation3 + $0x28] sm:$0xff]  ;;  %v576_v52 = vld [vmem:[#allocation3 + $0x30] sm:$0xff] }
  0x92   : > { %v525_v55 = vld [vmem:[#allocation2 + $0xd8] sm:$0xff]  ;;  %538 = vadd.xlane.f32.xlu0 %v537_v46  ;;  %v552_v62 = vadd.f32 %v551_v51, %v517_v36  ;;  %v607_v56 = vadd.f32 %v575_v61, %v574_v43  ;;  %v570_v63 = vld [vmem:[#allocation3] sm:$0xff]  ;;  %v571_v3 = vld [vmem:[#allocation3 + $0x8] sm:$0xff] }
  0x93   : > { %v561_v50 = vadd.f32 %v560_v53, %v524_v42  ;;  %v572_v4 = vld [vmem:[#allocation3 + $0x10] sm:$0xff]  ;;  %v602_v57 = vadd.f32 %v571_v3, %v570_v63  ;;  %v582_v60 = vld [vmem:[#allocation3 + $0x60] sm:$0xff]  ;;  %v583_v5 = vld [vmem:[#allocation3 + $0x68] sm:$0xff]  ;;  %v567_v8 = vadd.f32 %v566_v49, %v529_v54 }
  0x94   : > { %v578_v7 = vld [vmem:[#allocation3 + $0x40] sm:$0xff]  ;;  %v577_v10 = vld [vmem:[#allocation3 + $0x38] sm:$0xff]  ;;  %v608_v11 = vadd.f32 %v607_v56, %v576_v52  ;;  %v617_v13 = vadd.f32 %v583_v5, %v582_v60  ;;  %v579_v17 = vld [vmem:[#allocation3 + $0x48] sm:$0xff] }
  0x95   : > { %558 = vadd.xlane.f32.xlu1 %v557_v44  ;;  %v573_v12 = vld [vmem:[#allocation3 + $0x18] sm:$0xff]  ;;  %v562_v18 = vadd.f32 %v561_v50, %v525_v55  ;;  %v603_v58 = vadd.f32 %v602_v57, %v572_v4  ;;  %v584_v59 = vld [vmem:[#allocation3 + $0x70] sm:$0xff]  ;;  %v612_v19 = vadd.f32 %v579_v17, %v578_v7  ;;  %v590_v20 = vld [vmem:[#allocation3 + $0xa0] sm:$0xff] }
  0x96   : > { %553 = vadd.xlane.f32.xlu0 %v552_v62  ;;  %v591_v0 = vld [vmem:[#allocation3 + $0xa8] sm:$0xff]  ;;  %v580_v22 = vld [vmem:[#allocation3 + $0x50] sm:$0xff]  ;;  %v586_v2 = vld [vmem:[#allocation3 + $0x80] sm:$0xff]  ;;  %v609_v24 = vadd.f32 %v608_v11, %v577_v10  ;;  %v618_v26 = vadd.f32 %v617_v13, %v584_v59 }
  0x97   : > { %v587_v1 = vld [vmem:[#allocation3 + $0x88] sm:$0xff]  ;;  %v585_v25 = vld [vmem:[#allocation3 + $0x78] sm:$0xff]  ;;  %v627_v27 = vadd.f32 %v591_v0, %v590_v20  ;;  %v604_v9 = vadd.f32 %v603_v58, %v573_v12  ;;  %v613_v14 = vadd.f32 %v612_v19, %v580_v22  ;;  %v592_v31 = vld [vmem:[#allocation3 + $0xb0] sm:$0xff] }
  0x98   : > { %v581_v6 = vld [vmem:[#allocation3 + $0x58] sm:$0xff]  ;;  %v622_v32 = vadd.f32 %v587_v1, %v586_v2  ;;  %v598_v16 = vld [vmem:[#allocation3 + $0xe0] sm:$0xff]  ;;  %v599_v33 = vld [vmem:[#allocation3 + $0xe8] sm:$0xff]  ;;  %v619_v35 = vadd.f32 %v618_v26, %v585_v25 }
  0x99   : > { %568 = vadd.xlane.f32.xlu1 %v567_v8  ;;  %v588_v15 = vld [vmem:[#allocation3 + $0x90] sm:$0xff]  ;;  %v594_v21 = vld [vmem:[#allocation3 + $0xc0] sm:$0xff]  ;;  %v595_v34 = vld [vmem:[#allocation3 + $0xc8] sm:$0xff]  ;;  %v628_v38 = vadd.f32 %v627_v27, %v592_v31  ;;  %v637_v23 = vadd.f32 %v599_v33, %v598_v16  ;;  %v614_v39 = vadd.f32 %v613_v14, %v581_v6 }
  0x9a   : > { %563 = vadd.xlane.f32.xlu0 %v562_v18  ;;  %v593_v28 = vld [vmem:[#allocation3 + $0xb8] sm:$0xff]  ;;  %v623_v29 = vadd.f32 %v622_v32, %v588_v15  ;;  %v600_v40 = vld [vmem:[#allocation3 + $0xf0] sm:$0xff]  ;;  %v632_v41 = vadd.f32 %v595_v34, %v594_v21 }
  0x9b   : > { %v589_v45 = vld [vmem:[#allocation3 + $0x98] sm:$0xff]  ;;  %v596_v30 = vld [vmem:[#allocation3 + $0xd0] sm:$0xff]  ;;  %v629_v46 = vadd.f32 %v628_v38, %v593_v28  ;;  %v638_v36 = vadd.f32 %v637_v23, %v600_v40 }
  0x9c   : > { %v624_v37 = vadd.f32 %v623_v29, %v589_v45  ;;  %v601_v47 = vld [vmem:[#allocation3 + $0xf8] sm:$0xff]  ;;  %v633_v48 = vadd.f32 %v632_v41, %v596_v30 }
  0x9d   : > { %610 = vadd.xlane.f32.xlu1 %v609_v24  ;;  %v597_v51 = vld [vmem:[#allocation3 + $0xd8] sm:$0xff]  ;;  %v639_v42 = vadd.f32 %v638_v36, %v601_v47 }
  0x9e   : > { %605 = vadd.xlane.f32.xlu0 %v604_v9  ;;  %v634_v53 = vadd.f32 %v633_v48, %v597_v51  ;;  %v699_v51 = vld [vmem:[%s1638_s0 + $0x8] sm:$0xff] }
  0xa1   : > { %620 = vadd.xlane.f32.xlu1 %v619_v35 }
  0xa2   : > { %615 = vadd.xlane.f32.xlu0 %v614_v39 }
  0xa5   : > { %630 = vadd.xlane.f32.xlu1 %v629_v46 }
  0xa6   : > { %625 = vadd.xlane.f32.xlu0 %v624_v37 }
  0xa9   : > { %640 = vadd.xlane.f32.xlu1 %v639_v42 }
  0xaa   : > { %635 = vadd.xlane.f32.xlu0 %v634_v53  ;;  %v698_v53 = vld [vmem:[%s1638_s0] sm:$0xff] }
 0x11a   : > { %v544_v43 = vpop.xlane.xlu1 %543 }
 0x11b   : > { %v534_v44 = vpop.xlane.xlu0 %533  ;;  %v1486_v5 = vmul.f32 0.00048828125, %v544_v43 }
 0x11c   : > { %v1480_v56 = vmul.f32 0.00048828125, %v534_v44 }
 0x11d   : > { %v660_v20 = vmul.f32 %v1486_v5, %v1486_v5 }
 0x11e   : > { %v549_v54 = vpop.xlane.xlu1 %548  ;;  %v658_v7 = vmul.f32 %v1480_v56, %v1480_v56 }
 0x11f   : > { %v539_v49 = vpop.xlane.xlu0 %538  ;;  %v1482_v3 = vmul.f32 0.00048828125, %v549_v54 }
 0x120   : > { %v1478_v50 = vmul.f32 0.00048828125, %v539_v49 }
 0x121   : > { %v661_v18 = vmul.f32 %v1482_v3, %v1482_v3 }
 0x122   : > { %v559_v55 = vpop.xlane.xlu1 %558  ;;  %v659_v4 = vmul.f32 %v1478_v50, %v1478_v50 }
 0x123   : > { %v554_v61 = vpop.xlane.xlu0 %553  ;;  %v1490_v11 = vmul.f32 0.00048828125, %v559_v55 }
 0x124   : > { %v1492_v12 = vmul.f32 0.00048828125, %v554_v61 }
 0x125   : > { %v663_v24 = vmul.f32 %v1490_v11, %v1490_v11 }
 0x126   : > { %v569_v62 = vpop.xlane.xlu1 %568  ;;  %v662_v25 = vmul.f32 %v1492_v12, %v1492_v12 }
 0x127   : > { %v564_v52 = vpop.xlane.xlu0 %563  ;;  %v1502_v9 = vmul.f32 0.00048828125, %v569_v62  ;;  %v701_v62 = vld [vmem:[%s1638_s0 + $0x18] sm:$0xff] }
 0x128   : > { %v1504_v16 = vmul.f32 0.00048828125, %v564_v52 }
 0x129   : > { %v665_v39 = vmul.f32 %v1502_v9, %v1502_v9 }
 0x12a   : > { %v611_v63 = vpop.xlane.xlu1 %610  ;;  %v664_v41 = vmul.f32 %v1504_v16, %v1504_v16 }
 0x12b   : > { %v651_v57 = vmul.f32 0.00048828125, %v611_v63  ;;  %v606_v60 = vpop.xlane.xlu0 %605  ;;  %v700_v63 = vld [vmem:[%s1638_s0 + $0x10] sm:$0xff] }
 0x12c   : > { %v650_v8 = vmul.f32 0.00048828125, %v606_v60 }
 0x12d   : > { %v667_v10 = vsub.f32 %v651_v57, %v659_v4 }
 0x12e   : > { %v666_v13 = vsub.f32 %v650_v8, %v658_v7  ;;  %v621_v17 = vpop.xlane.xlu1 %620  ;;  %v703_v8 = vld [vmem:[%s1638_s0 + $0x28] sm:$0xff] }
 0x12f   : > { %v675_v58 = vmax.f32 %v667_v10, 0.0  ;;  %v653_v59 = vmul.f32 0.00048828125, %v621_v17  ;;  %v616_v19 = vpop.xlane.xlu0 %615 }
 0x130   : > { %v674_v0 = vmax.f32 %v666_v13, 0.0  ;;  %v652_v22 = vmul.f32 0.00048828125, %v616_v19  ;;  %v704_v19 = vld [vmem:[%s1638_s0 + $0x30] sm:$0xff] }
 0x131   : > { %v683_v2 = vadd.f32 1e-05, %v675_v58  ;;  %v669_v1 = vsub.f32 %v653_v59, %v661_v18  ;;  %v705_v59 = vld [vmem:[%s1638_s0 + $0x38] sm:$0xff] }
 0x132   : > { %v682_v26 = vadd.f32 1e-05, %v674_v0  ;;  %v668_v6 = vsub.f32 %v652_v22, %v660_v20  ;;  %v631_v27 = vpop.xlane.xlu1 %630 }
 0x133   : > { %921 = vrsqrt.f32 %v683_v2  ;;  %v677_v14 = vmax.f32 %v669_v1, 0.0  ;;  %v655_v31 = vmul.f32 0.00048828125, %v631_v27  ;;  %v626_v32 = vpop.xlane.xlu0 %625 }
 0x134   : > { %923 = vrsqrt.f32 %v682_v26  ;;  %v676_v33 = vmax.f32 %v668_v6, 0.0  ;;  %v654_v15 = vmul.f32 0.00048828125, %v626_v32 }
 0x135   : > { %v685_v21 = vadd.f32 1e-05, %v677_v14  ;;  %v671_v34 = vsub.f32 %v655_v31, %v663_v24 }
 0x136   : > { %v684_v35 = vadd.f32 1e-05, %v676_v33  ;;  %v670_v38 = vsub.f32 %v654_v15, %v662_v25  ;;  %v641_v23 = vpop.xlane.xlu1 %640 }
 0x137   : > { %925 = vrsqrt.f32 %v685_v21  ;;  %v679_v28 = vmax.f32 %v671_v34, 0.0  ;;  %v657_v29 = vmul.f32 0.00048828125, %v641_v23  ;;  %v636_v40 = vpop.xlane.xlu0 %635 }
 0x138   : > { %927 = vrsqrt.f32 %v684_v35  ;;  %v678_v45 = vmax.f32 %v670_v38, 0.0  ;;  %v656_v30 = vmul.f32 0.00048828125, %v636_v40 }
 0x139   : > { %v687_v46 = vadd.f32 1e-05, %v679_v28  ;;  %v673_v36 = vsub.f32 %v657_v29, %v665_v39 }
 0x13a   : > { %v686_v37 = vadd.f32 1e-05, %v678_v45  ;;  %v672_v47 = vsub.f32 %v656_v30, %v664_v41 }
 0x13b   : > { %929 = vrsqrt.f32 %v687_v46  ;;  %v681_v48 = vmax.f32 %v673_v36, 0.0 }
 0x13c   : > { %931 = vrsqrt.f32 %v686_v37  ;;  %v680_v42 = vmax.f32 %v672_v47, 0.0 }
 0x13d   : > { %v922_v43 = vpop.eup %921  ;;  %v689_v44 = vadd.f32 1e-05, %v681_v48 }
 0x13e   : > { %v924_v54 = vpop.eup %923  ;;  %v688_v49 = vadd.f32 1e-05, %v680_v42  ;;  %v707_v55 = vmul.f32 %v922_v43, %v699_v51 }
 0x13f   : > { %933 = vrsqrt.f32 %v689_v44  ;;  %v706_v61 = vmul.f32 %v924_v54, %v698_v53 }
 0x140   : > { %935 = vrsqrt.f32 %v688_v49  ;;  %v715_v52 = vmul.f32 %v707_v55, %v1478_v50  ;;  %764 = vst.msk [vmem:[%s1640_s2 + $0x8] sm:$0xff] %vm762_vm0, %v707_v55 }
 0x141   : > { %v926_v4 = vpop.eup %925  ;;  %v714_v57 = vmul.f32 %v706_v61, %v1480_v56  ;;  %763 = vst.msk [vmem:[%s1640_s2] sm:$0xff] %vm762_vm0, %v706_v61  ;;  %v702_v56 = vld [vmem:[%s1638_s0 + $0x20] sm:$0xff] }
 0x142   : > { %v928_v60 = vpop.eup %927  ;;  %732 = vrot.lane.b32.xlu1 %v715_v52, %s1040_s6  ;;  %v709_v50 = vmul.f32 %v926_v4, %v701_v62 }
 0x143   : > { %730 = vrot.lane.b32.xlu0 %v714_v57, %s1040_s6  ;;  %v708_v7 = vmul.f32 %v928_v60, %v700_v63 }
 0x144   : > { %766 = vst.msk [vmem:[%s1640_s2 + $0x18] sm:$0xff] %vm762_vm0, %v709_v50  ;;  %v717_v20 = vmul.f32 %v709_v50, %v1482_v3 }
 0x145   : > { %v930_v10 = vpop.eup %929  ;;  %v716_v13 = vmul.f32 %v708_v7, %v1486_v5  ;;  %765 = vst.msk [vmem:[%s1640_s2 + $0x10] sm:$0xff] %vm762_vm0, %v708_v7 }
 0x146   : > { %v932_v17 = vpop.eup %931  ;;  %v711_v18 = vmul.f32 %v930_v10, %v703_v8 }
 0x147   : > { %734 = vrot.lane.b32.xlu1 %v716_v13, %s1040_s6  ;;  %v710_v58 = vmul.f32 %v932_v17, %v702_v56 }
 0x148   : > { %768 = vst.msk [vmem:[%s1640_s2 + $0x28] sm:$0xff] %vm762_vm0, %v711_v18  ;;  %v719_v3 = vmul.f32 %v711_v18, %v1490_v11 }
 0x149   : > { %v934_v5 = vpop.eup %933  ;;  %v718_v0 = vmul.f32 %v710_v58, %v1492_v12  ;;  %767 = vst.msk [vmem:[%s1640_s2 + $0x20] sm:$0xff] %vm762_vm0, %v710_v58 }
 0x14a   : > { %v936_v22 = vpop.eup %935  ;;  %v713_v2 = vmul.f32 %v934_v5, %v705_v59 }
 0x14b   : > { %736 = vrot.lane.b32.xlu1 %v717_v20, %s1040_s6  ;;  %738 = vrot.lane.b32.xlu0 %v718_v0, %s1040_s6  ;;  %v712_v1 = vmul.f32 %v936_v22, %v704_v19 }
 0x14c   : > { %770 = vst.msk [vmem:[%s1640_s2 + $0x38] sm:$0xff] %vm762_vm0, %v713_v2  ;;  %v721_v24 = vmul.f32 %v713_v2, %v1502_v9 }
 0x14d   : > { %v720_v12 = vmul.f32 %v712_v1, %v1504_v16  ;;  %769 = vst.msk [vmem:[%s1640_s2 + $0x30] sm:$0xff] %vm762_vm0, %v712_v1 }
 0x14f   : > { %740 = vrot.lane.b32.xlu1 %v719_v3, %s1040_s6  ;;  %742 = vrot.lane.b32.xlu0 %v720_v12, %s1040_s6 }
 0x153   : > { %744 = vrot.lane.b32.xlu1 %v721_v24, %s1040_s6 }
 0x1b4   : > { %v733_v25 = vpop.permute.xlu1 %732 }
 0x1b5   : > { %v755_v26 = vsub.f32 %v699_v51, %v733_v25  ;;  %v731_v6 = vpop.permute.xlu0 %730 }
 0x1b6   : > { %v754_v11 = vsub.f32 %v698_v53, %v731_v6 }
 0x1b7   : > { %773 = vst.msk [vmem:[%s1640_s2 + $0x8] sm:$0xff] %vm771_vm1, %v755_v26 }
 0x1b8   : > { %772 = vst.msk [vmem:[%s1640_s2] sm:$0xff] %vm771_vm1, %v754_v11 }
 0x1b9   : > { %v735_v27 = vpop.permute.xlu1 %734 }
 0x1ba   : > { %v756_v14 = vsub.f32 %v700_v63, %v735_v27 }
 0x1bc   : > { %774 = vst.msk [vmem:[%s1640_s2 + $0x10] sm:$0xff] %vm771_vm1, %v756_v14 }
 0x1bd   : > { %v737_v9 = vpop.permute.xlu1 %736  ;;  %v739_v31 = vpop.permute.xlu0 %738 }
 0x1be   : > { %v757_v32 = vsub.f32 %v701_v62, %v737_v9  ;;  %v758_v16 = vsub.f32 %v702_v56, %v739_v31 }
 0x1c0   : > { %775 = vst.msk [vmem:[%s1640_s2 + $0x18] sm:$0xff] %vm771_vm1, %v757_v32  ;;  %776 = vst.msk [vmem:[%s1640_s2 + $0x20] sm:$0xff] %vm771_vm1, %v758_v16 }
 0x1c1   : > { %v741_v33 = vpop.permute.xlu1 %740  ;;  %v743_v15 = vpop.permute.xlu0 %742 }
 0x1c2   : > { %v759_v21 = vsub.f32 %v703_v8, %v741_v33  ;;  %v760_v34 = vsub.f32 %v704_v19, %v743_v15 }
 0x1c4   : > { %777 = vst.msk [vmem:[%s1640_s2 + $0x28] sm:$0xff] %vm771_vm1, %v759_v21  ;;  %778 = vst.msk [vmem:[%s1640_s2 + $0x30] sm:$0xff] %vm771_vm1, %v760_v34 }
 0x1c5   : > { %v745_v35 = vpop.permute.xlu1 %744 }
 0x1c6   : > { %v761_v38 = vsub.f32 %v705_v59, %v745_v35 }
 0x1c8   : > { %779 = vst.msk [vmem:[%s1640_s2 + $0x38] sm:$0xff] %vm771_vm1, %v761_v38 }
 0x1c9 PF: > { %s15_s16 = sadd.s32 1, %s1033_s16   ;;  %s1645_s9 = smov %s1009_s10 }
 0x1ca   : > { %p12_p7 = scmp.ge.s32.totalorder %s15_s16, 6   ;;  %s1646_s10 = smov %s1013_s11 }
 0x1cb   : > { %s1647_s11 = smov %s1123_s29  ;;  %s1648_s12 = smov %s1025_s14 }
 0x1cc   : > { %s1649_s13 = smov %s1029_s15  ;;  %s1650_s14 = smov %s1653_s18 }
 0x1cd   : > { %s1651_s15 = smov %s1657_s19  ;;  %14 = sbr.rel (!%p12_p7) target bundleno = 5 (0x5), region = 72 }
 0x1d4   :  { %791 = vsyncpa [#allocation5], 1 }
 0x1d5   :  { %793 = vsyncpa [#allocation5 + $0x1], 1 }

</bundles_post_ra>
